<compile_context>
chip_gen: v5e
topology: v5e:2x2
jax: 0.10.0
libtpu: 0.0.40
codegen_flags: <defaults>
</compile_context>

<pallas_src>
import functools
import numpy as np
import jax
import jax.numpy as jnp
from jax.experimental import pallas as pl
from jax.experimental.pallas import tpu as pltpu


def _round_up(x, m):
    return (x + m - 1) // m * m


def _build_layer_maps(depth, n_inner, leaf):
    """Densely packed selection tensors mapping inner-node probs -> per-leaf factors.

    Layer l occupies lanes [l*leaf, (l+1)*leaf).  For leaf L at layer l:
      ancestor k = L >> (depth - l); inner node n = 2**l - 1 + k
      branch bit j = (L >> (depth - l - 1)) & 1
      factor_l[:, L] = p[:, n] if j == 0 else 1 - p[:, n]
                     = (1 - 2j) * p[:, n] + j  =  (p @ A)[:, l*leaf + L] + C[:, l*leaf + L]
    """
    lanes = depth * leaf
    A = np.zeros((n_inner, lanes), dtype=np.float32)
    C = np.zeros((1, lanes), dtype=np.float32)
    for l in range(depth):
        for leaf_idx in range(leaf):
            k = leaf_idx >> (depth - l)
            n = (2 ** l - 1) + k
            j = (leaf_idx >> (depth - l - 1)) & 1
            A[n, l * leaf + leaf_idx] = 1.0 - 2.0 * j
            C[0, l * leaf + leaf_idx] = float(j)
    return A, C


def _sdt_kernel(x_ref, w1_ref, b1_ref, a_ref, c_ref, w2_ref, out_ref, num_ref, *,
                depth, leaf, batch, block_b, mxu_dtype):
    i = pl.program_id(0)

    # Inner nodes: logits = x @ W + b (bias column split out of torch's [1, x]).
    logits = jnp.dot(x_ref[...], w1_ref[...],
                     preferred_element_type=jnp.float32) + b1_ref[...]
    p = jax.nn.sigmoid(logits)                                  # (TB, n_inner) f32

    # All per-layer branch factors in ONE densely packed MXU call.
    factors = jnp.dot(p.astype(mxu_dtype), a_ref[...],
                      preferred_element_type=jnp.float32) + c_ref[...]   # (TB, depth*leaf)

    mu = None
    sums = []
    for l in range(depth):                                      # static unroll
        f_l = factors[:, l * leaf:(l + 1) * leaf]               # (TB, leaf) lane slice
        mu = f_l if mu is None else mu * f_l                    # leaf-expanded path prob
        if l == 0 and (batch % block_b != 0):
            # Only emitted when the last tile is ragged; masks padded batch rows
            # out of the penalty statistics (padded output rows are sliced away).
            row = jax.lax.broadcasted_iota(jnp.int32, (block_b, 1), 0) + i * block_b
            mu = jnp.where(row < batch, mu, 0.0)
        sums.append(jnp.sum(mu, axis=0, keepdims=True))         # (1, leaf)

    # Per-tile num partials: num_l[L] = sum_batch prod_{k<=l} factor_k[:, L].
    num_ref[...] = jnp.concatenate(sums, axis=1).reshape(1, 1, depth * leaf)

    # Leaf nodes: narrow (TB, out_dim) store — no padded lanes written to HBM.
    out_ref[...] = jnp.dot(mu.astype(mxu_dtype), w2_ref[...],
                           preferred_element_type=jnp.float32).astype(out_ref.dtype)


def sdt_forward(x, w_inner, w_leaf, *, depth, lamda, block_b=256,
                mxu_dtype=jnp.bfloat16):
    """x: (B, ...) f32. w_inner: (n_inner, F+1) (col 0 = bias of the leading 1).
    w_leaf: (out_dim, leaf_num). Returns (output (B, out_dim), penalty scalar)."""
    B = x.shape[0]
    x_flat = x.reshape(B, -1).astype(jnp.float32)
    F = x_flat.shape[1]
    leaf = 2 ** depth
    n_inner = 2 ** depth - 1
    out_dim = w_leaf.shape[0]
    lanes = depth * leaf

    TB = min(block_b, _round_up(B, 8))
    B_pad = _round_up(B, TB)
    G = B_pad // TB

    x_pad = x_flat if B_pad == B else jnp.pad(x_flat, ((0, B_pad - B), (0, 0)))
    x_in = x_pad.astype(mxu_dtype)                              # host-side cast (halves x DMA)

    # Split bias column out of w_inner; cast matmul operands on the host.
    w1 = w_inner[:, 1:].T.astype(mxu_dtype)                     # (F, n_inner)
    b1 = w_inner[:, :1].T.astype(jnp.float32)                   # (1, n_inner)
    A_np, C_np = _build_layer_maps(depth, n_inner, leaf)
    A = jnp.asarray(A_np, dtype=mxu_dtype)                      # exact in bf16 (entries 0/±1)
    C = jnp.asarray(C_np, dtype=jnp.float32)
    w2 = w_leaf.T.astype(mxu_dtype)                             # (leaf, out_dim)

    kernel = functools.partial(_sdt_kernel, depth=depth, leaf=leaf, batch=B,
                               block_b=TB, mxu_dtype=mxu_dtype)

    # TODO(synk): for very deep trees (depth >= ~10) the A slab grows; raise
    # vmem_limit_bytes / single-buffer the weight specs accordingly.
    out, num_part = pl.pallas_call(
        kernel,
        out_shape=(jax.ShapeDtypeStruct((B_pad, out_dim), jnp.float32),
                   jax.ShapeDtypeStruct((G, 1, lanes), jnp.float32)),
        grid=(G,),
        in_specs=[
            pl.BlockSpec((TB, F), lambda i: (i, 0)),            # x tile
            pl.BlockSpec((F, n_inner), lambda i: (0, 0)),       # W1
            pl.BlockSpec((1, n_inner), lambda i: (0, 0)),       # b1
            pl.BlockSpec((n_inner, lanes), lambda i: (0, 0)),   # packed A slab
            pl.BlockSpec((1, lanes), lambda i: (0, 0)),         # packed C slab
            pl.BlockSpec((leaf, out_dim), lambda i: (0, 0)),    # W2
        ],
        out_specs=(
            pl.BlockSpec((TB, out_dim), lambda i: (i, 0)),      # narrow output tile
            pl.BlockSpec((1, 1, lanes), lambda i: (i, 0, 0)),   # per-tile num partials
        ),
        # Each tile writes disjoint blocks; penalty reduction moved to the
        # epilogue, so the batch axis is "parallel" (v7x: both TensorCores).
        compiler_params=pltpu.CompilerParams(
            dimension_semantics=("parallel",),
            vmem_limit_bytes=32 * 1024 * 1024),
    )(x_in, w1, b1, A, C, w2)

    if B_pad != B:
        out = out[:B]

    # ---- Tiny penalty epilogue (plain XLA over (depth, leaf) statistics). ----
    num = num_part.reshape(G, lanes).sum(axis=0).reshape(depth, leaf)   # num_l[L]
    # den_l == num_{l-1}; den_0 == valid batch count B.
    den = jnp.concatenate(
        [jnp.full((1, leaf), float(B), jnp.float32), num[:-1]], axis=0)
    alpha = num / den
    # Keep the two logs separate (matches reference underflow behavior).
    logterm = jnp.log(alpha) + jnp.log(1.0 - alpha)
    # penalty_list[l] * 0.5 / replication (each (node,branch) appears
    # 2**(depth-l-1) times in the leaf-expanded representation).
    scales = np.asarray(
        [lamda * (2.0 ** (-l)) * 0.5 / (2 ** (depth - l - 1)) for l in range(depth)],
        dtype=np.float32).reshape(depth, 1)
    penalty = -jnp.sum(jnp.asarray(scales) * logterm)
    return out, penalty


def _sdt_reference(x, w_inner, w_leaf, *, depth, lamda):
    """Pure-JAX reference mirroring the PyTorch module."""
    B = x.shape[0]
    aug = jnp.concatenate([jnp.ones((B, 1), jnp.float32), x.reshape(B, -1)], axis=1)
    p = jax.nn.sigmoid(aug @ w_inner.T)                           # (B, n_inner)
    path_prob = jnp.stack([p, 1.0 - p], axis=2)                   # (B, n_inner, 2)
    mu = jnp.ones((B, 1, 1), jnp.float32)
    penalty = jnp.float32(0.0)
    penalty_list = [lamda * 2.0 ** (-d) for d in range(depth)]
    begin, end = 0, 1
    for l in range(depth):
        pp = path_prob[:, begin:end, :]                           # (B, 2^l, 2)
        mu2 = mu.reshape(B, 2 ** l)
        pp2 = pp.reshape(B, 2 ** (l + 1))
        for node in range(2 ** (l + 1)):
            alpha = jnp.sum(pp2[:, node] * mu2[:, node // 2]) / jnp.sum(mu2[:, node // 2])
            penalty = penalty - penalty_list[l] * 0.5 * (jnp.log(alpha) + jnp.log(1.0 - alpha))
        mu = mu.reshape(B, -1, 1) * pp
        begin, end = end, end + 2 ** (l + 1)
    mu = mu.reshape(B, 2 ** depth)
    return mu @ w_leaf.T, penalty


if __name__ == "__main__":
    # Module config (args): depth=3, input_dim=16, output_dim=4, lamda=1e-3.
    depth, input_dim, output_dim, lamda = 3, 16, 4, 1e-3
    inner_node_num = 2 ** depth - 1
    leaf_num = 2 ** depth
    B = 8

    key = jax.random.PRNGKey(0)
    kx, kw1, kw2 = jax.random.split(key, 3)
    x = jax.random.normal(kx, (B, input_dim), dtype=jnp.float32)
    w_inner = 0.1 * jax.random.normal(kw1, (inner_node_num, input_dim + 1), jnp.float32)
    w_leaf = 0.1 * jax.random.normal(kw2, (output_dim, leaf_num), jnp.float32)

    ref_out, ref_pen = _sdt_reference(x, w_inner, w_leaf, depth=depth, lamda=lamda)

    # 1) Default (bf16 MXU operands) — fast path, loose tolerance.
    out, penalty = sdt_forward(x, w_inner, w_leaf, depth=depth, lamda=lamda)
    out = jax.block_until_ready(out)
    penalty = jax.block_until_ready(penalty)
    np.testing.assert_allclose(np.asarray(out), np.asarray(ref_out), rtol=5e-2, atol=5e-3)
    np.testing.assert_allclose(np.asarray(penalty), np.asarray(ref_pen), rtol=5e-2, atol=2e-4)

    # 2) f32 MXU path — bit-level fidelity check.
    out32, pen32 = sdt_forward(x, w_inner, w_leaf, depth=depth, lamda=lamda,
                               mxu_dtype=jnp.float32)
    out32 = jax.block_until_ready(out32)
    pen32 = jax.block_until_ready(pen32)
    np.testing.assert_allclose(np.asarray(out32), np.asarray(ref_out), rtol=1e-4, atol=1e-5)
    np.testing.assert_allclose(np.asarray(pen32), np.asarray(ref_pen), rtol=1e-4, atol=1e-6)

    # 3) Multi-tile + ragged last tile (exercises the row mask & partial-sum path).
    B2 = 70
    x2 = jax.random.normal(jax.random.PRNGKey(1), (B2, input_dim), dtype=jnp.float32)
    ref_out2, ref_pen2 = _sdt_reference(x2, w_inner, w_leaf, depth=depth, lamda=lamda)
    out2, pen2 = sdt_forward(x2, w_inner, w_leaf, depth=depth, lamda=lamda,
                             block_b=32, mxu_dtype=jnp.float32)
    out2 = jax.block_until_ready(out2)
    pen2 = jax.block_until_ready(pen2)
    np.testing.assert_allclose(np.asarray(out2), np.asarray(ref_out2), rtol=1e-4, atol=1e-5)
    np.testing.assert_allclose(np.asarray(pen2), np.asarray(ref_pen2), rtol=1e-4, atol=1e-6)

    print("KERNEL_OK")
</pallas_src>

<mosaic_0001>
module attributes {stable_mosaic.version = 11 : i64} {
  func.func @_sdt_kernel(%arg0: i32, %arg1: memref<8x16xbf16, #tpu.memory_space<vmem>>, %arg2: memref<16x7xbf16, #tpu.memory_space<vmem>>, %arg3: memref<1x7xf32, #tpu.memory_space<vmem>>, %arg4: memref<7x24xbf16, #tpu.memory_space<vmem>>, %arg5: memref<1x24xf32, #tpu.memory_space<vmem>>, %arg6: memref<8x4xbf16, #tpu.memory_space<vmem>>, %arg7: memref<8x4xf32, #tpu.memory_space<vmem>>, %arg8: memref<1x1x24xf32, #tpu.memory_space<vmem>>) attributes {dimension_semantics = [#tpu.dimension_semantics<parallel>], iteration_bounds = array<i64: 1>, scalar_prefetch = 0 : i64, scratch_operands = 0 : i64, tpu.core_type = #tpu.core_type<tc>, window_params = [{transform_indices = @transform_0, window_bounds = array<i64: 8, 16>}, {pipeline_mode = #tpu.pipeline_mode<synchronous>, transform_indices = @transform_1, window_bounds = array<i64: 16, 7>}, {pipeline_mode = #tpu.pipeline_mode<synchronous>, transform_indices = @transform_2, window_bounds = array<i64: 1, 7>}, {pipeline_mode = #tpu.pipeline_mode<synchronous>, transform_indices = @transform_3, window_bounds = array<i64: 7, 24>}, {pipeline_mode = #tpu.pipeline_mode<synchronous>, transform_indices = @transform_4, window_bounds = array<i64: 1, 24>}, {pipeline_mode = #tpu.pipeline_mode<synchronous>, transform_indices = @transform_5, window_bounds = array<i64: 8, 4>}, {transform_indices = @transform_6, window_bounds = array<i64: 8, 4>}, {transform_indices = @transform_7, window_bounds = array<i64: 1, 1, 24>}]} {
    %c0 = arith.constant 0 : index
    %c0_0 = arith.constant 0 : index
    %0 = vector.load %arg1[%c0, %c0_0] : memref<8x16xbf16, #tpu.memory_space<vmem>>, vector<8x16xbf16>
    %c0_1 = arith.constant 0 : index
    %c0_2 = arith.constant 0 : index
    %1 = vector.load %arg2[%c0_1, %c0_2] : memref<16x7xbf16, #tpu.memory_space<vmem>>, vector<16x7xbf16>
    %cst = arith.constant dense<0.000000e+00> : vector<8x7xf32>
    %2 = tpu.matmul %0, %1, %cst {dimension_numbers = #tpu.dot_dimension_numbers<[1], [0], [0], [1], [0, 0, 1, 1], [], []>} : vector<8x16xbf16>, vector<16x7xbf16>, vector<8x7xf32> -> vector<8x7xf32>
    %c0_3 = arith.constant 0 : index
    %c0_4 = arith.constant 0 : index
    %3 = vector.load %arg3[%c0_3, %c0_4] : memref<1x7xf32, #tpu.memory_space<vmem>>, vector<1x7xf32>
    %4 = vector.broadcast %3 : vector<1x7xf32> to vector<8x7xf32>
    %5 = arith.addf %2, %4 : vector<8x7xf32>
    %6 = arith.negf %5 : vector<8x7xf32>
    %7 = math.exp %6 : vector<8x7xf32>
    %cst_5 = arith.constant 1.000000e+00 : f32
    %8 = vector.broadcast %cst_5 : f32 to vector<8x7xf32>
    %9 = arith.addf %8, %7 : vector<8x7xf32>
    %10 = arith.divf %8, %9 : vector<8x7xf32>
    %11 = arith.truncf %10 : vector<8x7xf32> to vector<8x7xbf16>
    %c0_6 = arith.constant 0 : index
    %c0_7 = arith.constant 0 : index
    %12 = vector.load %arg4[%c0_6, %c0_7] : memref<7x24xbf16, #tpu.memory_space<vmem>>, vector<7x24xbf16>
    %cst_8 = arith.constant dense<0.000000e+00> : vector<8x24xf32>
    %13 = tpu.matmul %11, %12, %cst_8 {dimension_numbers = #tpu.dot_dimension_numbers<[1], [0], [0], [1], [0, 0, 1, 1], [], []>} : vector<8x7xbf16>, vector<7x24xbf16>, vector<8x24xf32> -> vector<8x24xf32>
    %c0_9 = arith.constant 0 : index
    %c0_10 = arith.constant 0 : index
    %14 = vector.load %arg5[%c0_9, %c0_10] : memref<1x24xf32, #tpu.memory_space<vmem>>, vector<1x24xf32>
    %15 = vector.broadcast %14 : vector<1x24xf32> to vector<8x24xf32>
    %16 = arith.addf %13, %15 : vector<8x24xf32>
    %17 = vector.extract_strided_slice %16 {offsets = [0, 0], sizes = [8, 8], strides = [1, 1]} : vector<8x24xf32> to vector<8x8xf32>
    %cst_11 = arith.constant dense<0.000000e+00> : vector<8xf32>
    %18 = vector.multi_reduction <add>, %17, %cst_11 [0] : vector<8x8xf32> to vector<8xf32>
    %19 = vector.shape_cast %18 : vector<8xf32> to vector<1x8xf32>
    %20 = vector.extract_strided_slice %16 {offsets = [0, 8], sizes = [8, 8], strides = [1, 1]} : vector<8x24xf32> to vector<8x8xf32>
    %21 = arith.mulf %17, %20 : vector<8x8xf32>
    %cst_12 = arith.constant dense<0.000000e+00> : vector<8xf32>
    %22 = vector.multi_reduction <add>, %21, %cst_12 [0] : vector<8x8xf32> to vector<8xf32>
    %23 = vector.shape_cast %22 : vector<8xf32> to vector<1x8xf32>
    %24 = vector.extract_strided_slice %16 {offsets = [0, 16], sizes = [8, 8], strides = [1, 1]} : vector<8x24xf32> to vector<8x8xf32>
    %25 = arith.mulf %21, %24 : vector<8x8xf32>
    %cst_13 = arith.constant dense<0.000000e+00> : vector<8xf32>
    %26 = vector.multi_reduction <add>, %25, %cst_13 [0] : vector<8x8xf32> to vector<8xf32>
    %27 = vector.shape_cast %26 : vector<8xf32> to vector<1x8xf32>
    %28 = tpu.concatenate %19, %23, %27 in 1 : vector<1x8xf32>, vector<1x8xf32>, vector<1x8xf32> -> vector<1x24xf32>
    %29 = vector.shape_cast %28 : vector<1x24xf32> to vector<1x1x24xf32>
    %c0_14 = arith.constant 0 : index
    %c0_15 = arith.constant 0 : index
    %c0_16 = arith.constant 0 : index
    %30 = vector.load %arg8[%c0_14, %c0_15, %c0_16] : memref<1x1x24xf32, #tpu.memory_space<vmem>>, vector<1x1x24xf32>
    tpu.vector_store %arg8[%c0_14, %c0_15, %c0_16], %29 {strides = array<i32>} : memref<1x1x24xf32, #tpu.memory_space<vmem>>, vector<1x1x24xf32>,
    %31 = arith.truncf %25 : vector<8x8xf32> to vector<8x8xbf16>
    %c0_17 = arith.constant 0 : index
    %c0_18 = arith.constant 0 : index
    %32 = vector.load %arg6[%c0_17, %c0_18] : memref<8x4xbf16, #tpu.memory_space<vmem>>, vector<8x4xbf16>
    %cst_19 = arith.constant dense<0.000000e+00> : vector<8x4xf32>
    %33 = tpu.matmul %31, %32, %cst_19 {dimension_numbers = #tpu.dot_dimension_numbers<[1], [0], [0], [1], [0, 0, 1, 1], [], []>} : vector<8x8xbf16>, vector<8x4xbf16>, vector<8x4xf32> -> vector<8x4xf32>
    %c0_20 = arith.constant 0 : index
    %c0_21 = arith.constant 0 : index
    %34 = vector.load %arg7[%c0_20, %c0_21] : memref<8x4xf32, #tpu.memory_space<vmem>>, vector<8x4xf32>
    tpu.vector_store %arg7[%c0_20, %c0_21], %33 {strides = array<i32>} : memref<8x4xf32, #tpu.memory_space<vmem>>, vector<8x4xf32>,
    return
  }
  func.func @transform_0(%arg0: i32) -> (i32, i32) {
    %c0_i32 = arith.constant 0 : i32
    %c0_i32_0 = arith.constant 0 : i32
    return %arg0, %c0_i32 : i32, i32
  }
  func.func @transform_1(%arg0: i32) -> (i32, i32) {
    %c0_i32 = arith.constant 0 : i32
    %c0_i32_0 = arith.constant 0 : i32
    %c0_i32_1 = arith.constant 0 : i32
    return %c0_i32, %c0_i32_0 : i32, i32
  }
  func.func @transform_2(%arg0: i32) -> (i32, i32) {
    %c0_i32 = arith.constant 0 : i32
    %c0_i32_0 = arith.constant 0 : i32
    %c0_i32_1 = arith.constant 0 : i32
    return %c0_i32, %c0_i32_0 : i32, i32
  }
  func.func @transform_3(%arg0: i32) -> (i32, i32) {
    %c0_i32 = arith.constant 0 : i32
    %c0_i32_0 = arith.constant 0 : i32
    %c0_i32_1 = arith.constant 0 : i32
    return %c0_i32, %c0_i32_0 : i32, i32
  }
  func.func @transform_4(%arg0: i32) -> (i32, i32) {
    %c0_i32 = arith.constant 0 : i32
    %c0_i32_0 = arith.constant 0 : i32
    %c0_i32_1 = arith.constant 0 : i32
    return %c0_i32, %c0_i32_0 : i32, i32
  }
  func.func @transform_5(%arg0: i32) -> (i32, i32) {
    %c0_i32 = arith.constant 0 : i32
    %c0_i32_0 = arith.constant 0 : i32
    %c0_i32_1 = arith.constant 0 : i32
    return %c0_i32, %c0_i32_0 : i32, i32
  }
  func.func @transform_6(%arg0: i32) -> (i32, i32) {
    %c0_i32 = arith.constant 0 : i32
    %c0_i32_0 = arith.constant 0 : i32
    return %arg0, %c0_i32 : i32, i32
  }
  func.func @transform_7(%arg0: i32) -> (i32, i32, i32) {
    %c0_i32 = arith.constant 0 : i32
    %c0_i32_0 = arith.constant 0 : i32
    %c0_i32_1 = arith.constant 0 : i32
    return %arg0, %c0_i32, %c0_i32_0 : i32, i32, i32
  }
}

</mosaic_0001>

<bundles_post_ra>
// kernel: tpu_custom_call.1
= control target key start
LH: loop header
LB: loop body
LE: loop exit
PB: predicated region body
PF: predicated region fallthrough
CT: control target
= control target key end

     0   :  { %s318_s0 = inlined_call_operand.vmem [shape: bf16[8,16], index: 0, kind: input, shape index: {}]   ;;  %s319_s1 = inlined_call_operand.vmem [shape: bf16[16,7], index: 1, kind: input, shape index: {}]   ;;  %s320_s2 = inlined_call_operand.vmem [shape: f32[1,7], index: 2, kind: input, shape index: {}]   ;;  %s321_s3 = inlined_call_operand.vmem [shape: bf16[7,24], index: 3, kind: input, shape index: {}]   ;;  %s322_s4 = inlined_call_operand.vmem [shape: f32[1,24], index: 4, kind: input, shape index: {}]   ;;  %s323_s5 = inlined_call_operand.vmem [shape: bf16[8,4], index: 5, kind: input, shape index: {}]   ;;  %s324_s6 = inlined_call_operand.vmem [shape: f32[8,4], index: 6, kind: output, shape index: {0}]   ;;  %s325_s7 = inlined_call_operand.hbm [shape: f32[1,1,24], index: 7, kind: output, shape index: {1}]  }
   0x1   :  { %v200_v0 = vld [vmem:[%s319_s1] sm:$0xff] }
   0x2   :  { %13 = vsyncpa [#allocation3], 0  ;;  %51 = vmatpush.bf16.msra.mxu0 %v200_v0  ;;  %v27_v1 = vld [vmem:[%s318_s0] sm:$0xf]  ;;  %vm40_vm0 = vcmask 130048   ;;  %vm86_vm1 = vcmask 1042432  }
   0x3   :  { %v77_v2 = vld [vmem:[%s321_s3] sm:$0xf]  ;;  %vm87_vm2 = vcmask 1043456   ;;  %v239_v3 = vmov 65535   ;;  %vm82_vm7 = vcmask 56320   ;;  %s240_s3 = smov 120  }
   0x4   :  { %v88_v4 = vsel %vm86_vm1, 4294967295, %v239_v3  ;;  %v207_v7 = vld [vmem:[%s320_s2] ss:$0 sm:$0xff]  ;;  %s241_s8 = smov 112   ;;  %vm106_vm8 = vcmask 64512   ;;  %s244_s11 = smov [#allocation2]  }
   0x5   :  { %196 = vmatmul.msk.bf16.vlgmr.msra.gmra.mxu0 %vm40_vm0, %v27_v1  ;;  %v89_v5 = vsel %vm87_vm2, %v88_v4, 0  ;;  %v208_v25 = vld [vmem:[%s322_s4] ss:$0 sm:$0xff]  ;;  %s242_s4 = smov 8   ;;  %s179_s12 = sshll.u32 %s244_s11, 4  ;;  %vm147_vm9 = vcmask 188416   ;;  %s180_s12 = int_to_ptr.vmem [resolvable:$true] %s179_s12 }
   0x6   :  { %v91_v6 = vand.u32 %v89_v5, %v77_v2  ;;  %v150_v29 = vld [vmem:[%s323_s5] sm:$0xf]  ;;  %s243_s5 = smov 16   ;;  %s181_s15 = sshll.u32 %s325_s7, 4  ;;  %vm170_vm10 = vcmask 31744   ;;  %s182_s15 = int_to_ptr.hbm [resolvable:$true] %s181_s15 }
   0x7   :  { %v155_v30 = vsel %vm87_vm2, %v150_v29, 0 }
   0x8   :  { %100 = vmatpush.bf16.msra.mxu1 %v91_v6  ;;  %164 = vmatpush.bf16.msra.mxu2 %v155_v30 }
  0x82   :  { %v53_v8 = vpop.f32.mrf.mxu0 }
  0x83   :  { %v54_v9 = vadd.f32 %v207_v7, %v53_v8 }
  0x85   :  { %v197_v10 = vmul.f32 -1.442695, %v54_v9 }
  0x87   :  { %209 = vpow2.f32 %v197_v10 }
  0x8a   :  { %v55_v11 = vpop.f32.mrf.mxu0 }
  0x8d   :  { %v210_v12 = vpop.eup %209 }
  0x8e   :  { %v60_v13 = vadd.f32 1.0, %v210_v12 }
  0x90   :  { %211 = vrcp.f32 %v60_v13  ;;  %v72_v17 = vand.u32 2147483648, %v60_v13  ;;  %v70_v19 = vand.u32 2147483647, %v60_v13  ;;  %vm66_vm4 = vweird.f32 %v60_v13 }
  0x92   :  { %v73_v21 = vor.u32 1.1754944e-38, %v72_v17  ;;  %vm71_vm6 = vcmp.eq.f32.partialorder %v70_v19, 8.507059e+37 }
  0x96   :  { %v212_v14 = vpop.eup %211 }
  0x97   :  { %v62_v15 = vmul.f32 %v212_v14, %v60_v13  ;;  %vm67_vm3 = vweird.f32 %v212_v14 }
  0x98   :  { %vm68_vm5 = vmor %vm66_vm4, %vm67_vm3 }
  0x99   :  { %v63_v16 = vsub.f32 1.0, %v62_v15 }
  0x9b   :  { %v64_v18 = vmul.f32 %v212_v14, %v63_v16 }
  0x9d   :  { %v65_v20 = vadd.f32 %v212_v14, %v64_v18 }
  0x9f   :  { %v69_v22 = vsel %vm68_vm5, %v212_v14, %v65_v20 }
  0xa0   :  { %v74_v23 = vsel %vm71_vm6, %v73_v21, %v69_v22 }
  0xa1   :  { %v76_v24 = vpack.c.bf16 %v74_v23, %v74_v23 }
  0xa3   :  { %198 = vmatmul.msk.bf16.vlgmr.msra.gmra.mxu1 %vm82_vm7, %v76_v24 }
 0x120   :  { %v102_v26 = vpop.f32.mrf.mxu1 }
 0x121   :  { %v103_v27 = vadd.f32 %v208_v25, %v102_v26 }
 0x123   :  { %115 = vrot.lane.b32.xlu0 %v103_v27, %s240_s3  ;;  %v107_v50 = vsel %vm106_vm8, %v103_v27, 0.0 }
 0x124   :  { %v108_v51 = vrot.slane %v107_v50, 4 }
 0x126   :  { %v109_v52 = vadd.f32 %v108_v51, %v107_v50 }
 0x128   :  { %v104_v28 = vpop.f32.mrf.mxu1  ;;  %v110_v53 = vrot.slane %v109_v52, 2 }
 0x12a   :  { %v111_v54 = vadd.f32 %v110_v53, %v109_v52 }
 0x12b   :  { %126 = vrot.lane.b32.xlu0 %v103_v27, %s241_s8 }
 0x12c   :  { %v112_v56 = vrot.slane %v111_v54, 1 }
 0x12e   :  { %v113_v57 = vadd.f32 %v112_v56, %v111_v54 }
 0x195   :  { %v116_v31 = vpop.permute.xlu0 %115 }
 0x196   :  { %v118_v32 = vmul.f32 %v116_v31, %v103_v27 }
 0x198   :  { %v119_v33 = vsel %vm106_vm8, %v118_v32, 0.0 }
 0x199   :  { %v120_v34 = vrot.slane %v119_v33, 4 }
 0x19b   :  { %v121_v35 = vadd.f32 %v120_v34, %v119_v33 }
 0x19d   :  { %v127_v36 = vpop.permute.xlu0 %126  ;;  %v122_v37 = vrot.slane %v121_v35, 2 }
 0x19e   :  { %v129_v38 = vmul.f32 %v127_v36, %v118_v32 }
 0x19f   :  { %v123_v39 = vadd.f32 %v122_v37, %v121_v35 }
 0x1a0   :  { %v130_v40 = vsel %vm106_vm8, %v129_v38, 0.0  ;;  %v149_v41 = vpack.c.bf16 %v129_v38, %v129_v38 }
 0x1a1   :  { %v131_v42 = vrot.slane %v130_v40, 4  ;;  %v124_v43 = vrot.slane %v123_v39, 1 }
 0x1a2   :  { %199 = vmatmul.msk.bf16.vlgmr.msra.gmra.mxu2 %vm106_vm8, %v149_v41 }
 0x1a3   :  { %v132_v44 = vadd.f32 %v131_v42, %v130_v40  ;;  %v125_v45 = vadd.f32 %v124_v43, %v123_v39 }
 0x1a5   :  { %v133_v46 = vrot.slane %v132_v44, 2  ;;  %138 = vrot.lane.b32.xlu1 %v125_v45, %s242_s4 }
 0x1a7   :  { %v134_v47 = vadd.f32 %v133_v46, %v132_v44 }
 0x1a9   :  { %v135_v48 = vrot.slane %v134_v47, 1 }
 0x1ab   :  { %v136_v49 = vadd.f32 %v135_v48, %v134_v47 }
 0x1ad   :  { %142 = vrot.lane.b32.xlu1 %v136_v49, %s243_s5 }
 0x217   :  { %v139_v55 = vpop.permute.xlu1 %138 }
 0x218   :  { %v145_v58 = vsel %vm106_vm8, %v113_v57, %v139_v55 }
 0x21f   :  { %v143_v59 = vpop.permute.xlu1 %142 }
 0x220   :  { %v146_v60 = vsel %vm40_vm0, %v145_v58, %v143_v59 }
 0x221   :  { %148 = vst.msk [vmem:[#allocation2] sm:$0x1] %vm147_vm9, %v146_v60 }
 0x222   :  { %184 = dma.vmem_to_hbm [thread:$0]  %s180_s12, 16, %s182_s15, [#allocation3]  }
 0x225   :  { %v166_v61 = vpop.f32.mrf.mxu2 }
 0x226   :  { %171 = vst.msk [vmem:[%s324_s6] sm:$0xff] %vm170_vm10, %v166_v61 }
 0x22d   :  { %v168_v62 = vpop.f32.mrf.mxu2 }
 0x22e   :  { %237 = dma.done.wait [#allocation3], 16  }
 0x22f   :  { %238 = vsyncadd [#allocation3], 4294967280 }
 0x230   :  { %191 = vsyncpa [#allocation3], 1 }

</bundles_post_ra>
